<compile_context>
chip_gen: v5e
topology: v5e:2x2
jax: 0.10.0
libtpu: 0.0.40
codegen_flags: <defaults>
</compile_context>

<pallas_src>
import jax
import jax.numpy as jnp
from jax.experimental import pallas as pl
from jax.experimental.pallas import tpu as pltpu


def _log_sigmoid(x):
    # numerically stable logsigmoid(x) = min(x, 0) - log1p(exp(-|x|))  (EUP path)
    return jnp.minimum(x, 0.0) - jnp.log1p(jnp.exp(-jnp.abs(x)))


def skipgram_loss_kernel(pos_u_ref, idx_ref, table_hbm, out_ref, table_vmem, acc_ref):
    # pos_u_ref : [TB, D]  f32   u embeddings for this batch tile
    # idx_ref   : [TB, S]  i32   S = K+1; column 0 = pos_v, columns 1.. = neg_v
    # table_hbm : [V, D]   f32   full v_embeddings table, left in HBM (pl.ANY)
    # out_ref   : [1,1,1]  f32   per-core partial loss
    # table_vmem: [V, D]   f32   single-buffered resident copy of the table
    # acc_ref   : [1, 1]   f32   loss accumulator scratch
    step = pl.program_id(1)
    nsteps = pl.num_programs(1)

    @pl.when(step == 0)
    def _():
        # Single-buffered table load: one DMA per core (vs. default BlockSpec
        # double-buffering), and a zeroed accumulator.
        pltpu.sync_copy(table_hbm, table_vmem)
        acc_ref[...] = jnp.zeros_like(acc_ref)

    pos_u = pos_u_ref[...]                       # [TB, D]
    idx = idx_ref[...]                           # [TB, S]
    table = table_vmem[...]                      # [V, D]
    TB, S = idx.shape
    V = table.shape[0]

    # --- MXU row gather: one-hot [S*TB, V] @ table [V, D] ------------------
    # s-major row order: rows [s*TB, (s+1)*TB) correspond to sample s.
    # NOTE: invalid (out-of-range) indices gather a zero row instead of
    #       wrapping like fancy indexing would; inputs are assumed valid.
    v_iota = jax.lax.broadcasted_iota(jnp.int32, (TB, V), 1)
    onehot_cat = jnp.concatenate(
        [(v_iota == idx[:, s:s + 1]).astype(jnp.float32) for s in range(S)],
        axis=0)                                                   # [S*TB, V]
    gathered = jnp.dot(onehot_cat, table,
                       preferred_element_type=jnp.float32)        # [S*TB, D] (MXU)

    # u replicated per sample (sublane concat; TB is a multiple of 8).
    u_cat = jnp.concatenate([pos_u] * S, axis=0)                  # [S*TB, D]

    # Tiny per-sample dot over D (VPU multiply + lane reduce).
    dots = jnp.sum(gathered * u_cat, axis=-1, keepdims=True)      # [S*TB, 1]

    # s-major layout => the first TB rows are the positive sample (+), rest (-).
    row = jax.lax.broadcasted_iota(jnp.int32, (S * TB, 1), 0)
    signed = jnp.where(row < TB, dots, -dots)

    scores = _log_sigmoid(signed)                                 # EUP
    acc_ref[...] = acc_ref[...] - jnp.sum(scores)

    @pl.when(step == nsteps - 1)
    def _():
        out_ref[...] = acc_ref[...].reshape(1, 1, 1)


def skipgram_v_forward(pos_u, pos_v, neg_v, v_embeddings, *,
                       tile_b=256, num_partials=2):
    pos_u = pos_u.astype(jnp.float32)
    table = v_embeddings.astype(jnp.float32)
    B, D = pos_u.shape
    K = neg_v.shape[1]
    S = K + 1
    V = table.shape[0]

    # Fuse pos_v as the 0th "sample" of each row: [B, K+1].
    idx = jnp.concatenate([pos_v[:, None], neg_v], axis=1).astype(jnp.int32)

    # Per-core batch shard (v7x has 2 TensorCores; serial no-op on v5e/v6e).
    if B % num_partials != 0 or (B // num_partials) % 8 != 0:
        num_partials = 1
    b_shard = B // num_partials

    # Batch tile: biggest multiple of 8 (sublane rule) that divides the shard,
    # capped by the tile_b parameter (shrink per generation if VMEM-bound).
    tb = min(tile_b, b_shard)
    if b_shard % tb != 0 or (tb % 8 != 0 and tb != b_shard):
        tb = b_shard
    nt = b_shard // tb

    partials = pl.pallas_call(
        skipgram_loss_kernel,
        out_shape=jax.ShapeDtypeStruct((num_partials, 1, 1), jnp.float32),
        grid_spec=pltpu.PrefetchScalarGridSpec(
            num_scalar_prefetch=0,
            grid=(num_partials, nt),
            in_specs=[
                pl.BlockSpec((tb, D), lambda c, i: (c * nt + i, 0)),   # pos_u tile
                pl.BlockSpec((tb, S), lambda c, i: (c * nt + i, 0)),   # fused idx tile
                pl.BlockSpec(memory_space=pl.ANY),                     # table in HBM
            ],
            out_specs=pl.BlockSpec((1, 1, 1), lambda c, i: (c, 0, 0)),
            scratch_shapes=[
                pltpu.VMEM((V, D), jnp.float32),   # resident, single-buffered table
                pltpu.VMEM((1, 1), jnp.float32),   # loss accumulator
            ],
        ),
        compiler_params=pltpu.CompilerParams(
            dimension_semantics=("parallel", "arbitrary"),
            vmem_limit_bytes=32 * 1024 * 1024,
        ),
    )(pos_u, idx, table)
    return jnp.sum(partials)


def reference_forward(pos_u, pos_v, neg_v, v_embeddings):
    emb_v = v_embeddings[pos_v]                                    # [B, D]
    neg_emb_v = v_embeddings[neg_v]                                # [B, K, D]
    score = jax.nn.log_sigmoid(jnp.sum(pos_u * emb_v, axis=1))
    neg_score = jax.nn.log_sigmoid(
        -jnp.sum(neg_emb_v * pos_u[:, None, :], axis=-1))
    return -(jnp.sum(score) + jnp.sum(neg_score))


if __name__ == "__main__":
    V, D, B, K = 50, 32, 16, 5  # vocab, embedding_dim, batch, neg samples

    key = jax.random.PRNGKey(0)
    k1, k2, k3, k4 = jax.random.split(key, 4)

    # Deterministic parameter init.  The module's __init__ zeros the weights
    # (uniform_(-0, 0)); we use the intended uniform(-0.5/D, 0.5/D) so the
    # kernel is exercised on non-trivial values.
    init_range = 0.5 / D
    v_embeddings = jax.random.uniform(
        k1, (V, D), jnp.float32, minval=-init_range, maxval=init_range)

    pos_u = jax.random.normal(k2, (B, D), dtype=jnp.float32)
    pos_v = jax.random.randint(k3, (B,), 0, V, dtype=jnp.int32)
    neg_v = jax.random.randint(k4, (B, K), 0, V, dtype=jnp.int32)

    loss = skipgram_v_forward(pos_u, pos_v, neg_v, v_embeddings)
    loss = jax.block_until_ready(loss)

    ref = reference_forward(pos_u, pos_v, neg_v, v_embeddings)
    assert jnp.allclose(loss, ref, rtol=1e-5, atol=1e-4), (loss, ref)

    print("KERNEL_OK")
</pallas_src>

<mosaic_0001>
module attributes {stable_mosaic.version = 11 : i64} {
  func.func @skipgram_loss_kernel(%arg0: i32, %arg1: i32, %arg2: memref<8x32xf32, #tpu.memory_space<vmem>>, %arg3: memref<8x6xi32, #tpu.memory_space<vmem>>, %arg4: memref<50x32xf32, #tpu.memory_space<any>>, %arg5: memref<1x1x1xf32, #tpu.memory_space<vmem>>, %arg6: memref<50x32xf32, #tpu.memory_space<vmem>>, %arg7: memref<1x1xf32, #tpu.memory_space<vmem>>) attributes {dimension_semantics = [#tpu.dimension_semantics<parallel>, #tpu.dimension_semantics<arbitrary>], iteration_bounds = array<i64: 2, 1>, scalar_prefetch = 0 : i64, scratch_operands = 2 : i64, tpu.core_type = #tpu.core_type<tc>, window_params = [{transform_indices = @transform_0, window_bounds = array<i64: 8, 32>}, {transform_indices = @transform_1, window_bounds = array<i64: 8, 6>}, {}, {transform_indices = @transform_3, window_bounds = array<i64: 1, 1, 1>}]} {
    %c0_i32 = arith.constant 0 : i32
    %0 = arith.cmpi eq, %arg1, %c0_i32 : i32
    %1 = arith.extui %0 : i1 to i32
    %c0_i32_0 = arith.constant 0 : i32
    %2 = arith.cmpi ne, %1, %c0_i32_0 : i32
    scf.if %2 {
      "tpu.region"() ({
        %70 = tpu.sem_alloc : memref<!tpu.dma_semaphore, #tpu.memory_space<semaphore_mem>>
        tpu.enqueue_dma source(%arg4 : memref<50x32xf32, #tpu.memory_space<any>>) target(%arg6 : memref<50x32xf32, #tpu.memory_space<vmem>>) target_semaphore(%70 : memref<!tpu.dma_semaphore, #tpu.memory_space<semaphore_mem>>)
        tpu.wait_dma2 semaphore(%70 : memref<!tpu.dma_semaphore, #tpu.memory_space<semaphore_mem>>) src(%arg4 : memref<50x32xf32, #tpu.memory_space<any>>) dst(%arg6 : memref<50x32xf32, #tpu.memory_space<vmem>>)
        tpu.yield
      }) : () -> ()
      %cst_17 = arith.constant 0.000000e+00 : f32
      %68 = vector.broadcast %cst_17 : f32 to vector<1x1xf32>
      %c0_18 = arith.constant 0 : index
      %c0_19 = arith.constant 0 : index
      %69 = vector.load %arg7[%c0_18, %c0_19] : memref<1x1xf32, #tpu.memory_space<vmem>>, vector<1x1xf32>
      tpu.vector_store %arg7[%c0_18, %c0_19], %68 {strides = array<i32>} : memref<1x1xf32, #tpu.memory_space<vmem>>, vector<1x1xf32>,
    } else {
    }
    %c0 = arith.constant 0 : index
    %c0_1 = arith.constant 0 : index
    %3 = vector.load %arg2[%c0, %c0_1] : memref<8x32xf32, #tpu.memory_space<vmem>>, vector<8x32xf32>
    %c0_2 = arith.constant 0 : index
    %c0_3 = arith.constant 0 : index
    %4 = vector.load %arg3[%c0_2, %c0_3] : memref<8x6xi32, #tpu.memory_space<vmem>>, vector<8x6xi32>
    %c0_4 = arith.constant 0 : index
    %c0_5 = arith.constant 0 : index
    %5 = vector.load %arg6[%c0_4, %c0_5] : memref<50x32xf32, #tpu.memory_space<vmem>>, vector<50x32xf32>
    %6 = tpu.iota {dimensions = array<i32: 1>} : vector<8x50xi32>
    %7 = vector.extract_strided_slice %4 {offsets = [0, 0], sizes = [8, 1], strides = [1, 1]} : vector<8x6xi32> to vector<8x1xi32>
    %8 = vector.broadcast %7 : vector<8x1xi32> to vector<8x50xi32>
    %9 = arith.cmpi eq, %6, %8 : vector<8x50xi32>
    %10 = arith.extui %9 : vector<8x50xi1> to vector<8x50xi32>
    %11 = arith.sitofp %10 : vector<8x50xi32> to vector<8x50xf32>
    %12 = vector.extract_strided_slice %4 {offsets = [0, 1], sizes = [8, 1], strides = [1, 1]} : vector<8x6xi32> to vector<8x1xi32>
    %13 = vector.broadcast %12 : vector<8x1xi32> to vector<8x50xi32>
    %14 = arith.cmpi eq, %6, %13 : vector<8x50xi32>
    %15 = arith.extui %14 : vector<8x50xi1> to vector<8x50xi32>
    %16 = arith.sitofp %15 : vector<8x50xi32> to vector<8x50xf32>
    %17 = vector.extract_strided_slice %4 {offsets = [0, 2], sizes = [8, 1], strides = [1, 1]} : vector<8x6xi32> to vector<8x1xi32>
    %18 = vector.broadcast %17 : vector<8x1xi32> to vector<8x50xi32>
    %19 = arith.cmpi eq, %6, %18 : vector<8x50xi32>
    %20 = arith.extui %19 : vector<8x50xi1> to vector<8x50xi32>
    %21 = arith.sitofp %20 : vector<8x50xi32> to vector<8x50xf32>
    %22 = vector.extract_strided_slice %4 {offsets = [0, 3], sizes = [8, 1], strides = [1, 1]} : vector<8x6xi32> to vector<8x1xi32>
    %23 = vector.broadcast %22 : vector<8x1xi32> to vector<8x50xi32>
    %24 = arith.cmpi eq, %6, %23 : vector<8x50xi32>
    %25 = arith.extui %24 : vector<8x50xi1> to vector<8x50xi32>
    %26 = arith.sitofp %25 : vector<8x50xi32> to vector<8x50xf32>
    %27 = vector.extract_strided_slice %4 {offsets = [0, 4], sizes = [8, 1], strides = [1, 1]} : vector<8x6xi32> to vector<8x1xi32>
    %28 = vector.broadcast %27 : vector<8x1xi32> to vector<8x50xi32>
    %29 = arith.cmpi eq, %6, %28 : vector<8x50xi32>
    %30 = arith.extui %29 : vector<8x50xi1> to vector<8x50xi32>
    %31 = arith.sitofp %30 : vector<8x50xi32> to vector<8x50xf32>
    %32 = vector.extract_strided_slice %4 {offsets = [0, 5], sizes = [8, 1], strides = [1, 1]} : vector<8x6xi32> to vector<8x1xi32>
    %33 = vector.broadcast %32 : vector<8x1xi32> to vector<8x50xi32>
    %34 = arith.cmpi eq, %6, %33 : vector<8x50xi32>
    %35 = arith.extui %34 : vector<8x50xi1> to vector<8x50xi32>
    %36 = arith.sitofp %35 : vector<8x50xi32> to vector<8x50xf32>
    %37 = tpu.concatenate %11, %16, %21, %26, %31, %36 in 0 : vector<8x50xf32>, vector<8x50xf32>, vector<8x50xf32>, vector<8x50xf32>, vector<8x50xf32>, vector<8x50xf32> -> vector<48x50xf32>
    %cst = arith.constant dense<0.000000e+00> : vector<48x32xf32>
    %38 = tpu.matmul %37, %5, %cst {dimension_numbers = #tpu.dot_dimension_numbers<[1], [0], [0], [1], [0, 0, 1, 1], [], []>} : vector<48x50xf32>, vector<50x32xf32>, vector<48x32xf32> -> vector<48x32xf32>
    %39 = tpu.concatenate %3, %3, %3, %3, %3, %3 in 0 : vector<8x32xf32>, vector<8x32xf32>, vector<8x32xf32>, vector<8x32xf32>, vector<8x32xf32>, vector<8x32xf32> -> vector<48x32xf32>
    %40 = arith.mulf %38, %39 : vector<48x32xf32>
    %cst_6 = arith.constant dense<0.000000e+00> : vector<48xf32>
    %41 = vector.multi_reduction <add>, %40, %cst_6 [1] : vector<48x32xf32> to vector<48xf32>
    %42 = vector.shape_cast %41 : vector<48xf32> to vector<48x1xf32>
    %43 = tpu.iota {dimensions = array<i32: 0>} : vector<48x1xi32>
    %c8_i32 = arith.constant 8 : i32
    %44 = vector.broadcast %c8_i32 : i32 to vector<48x1xi32>
    %45 = arith.cmpi slt, %43, %44 : vector<48x1xi32>
    %cst_7 = arith.constant 0.000000e+00 : f32
    %46 = vector.broadcast %cst_7 : f32 to vector<48x1xf32>
    %47 = arith.subf %46, %42 : vector<48x1xf32>
    %48 = arith.select %45, %42, %47 : vector<48x1xi1>, vector<48x1xf32>
    %cst_8 = arith.constant 0.000000e+00 : f32
    %49 = vector.broadcast %cst_8 : f32 to vector<48x1xf32>
    %50 = arith.minimumf %48, %49 : vector<48x1xf32>
    %51 = math.absf %48 : vector<48x1xf32>
    %cst_9 = arith.constant 0.000000e+00 : f32
    %52 = vector.broadcast %cst_9 : f32 to vector<48x1xf32>
    %53 = arith.subf %52, %51 : vector<48x1xf32>
    %54 = math.exp %53 : vector<48x1xf32>
    %55 = math.log1p %54 : vector<48x1xf32>
    %56 = arith.subf %50, %55 : vector<48x1xf32>
    %c0_10 = arith.constant 0 : index
    %c0_11 = arith.constant 0 : index
    %57 = vector.load %arg7[%c0_10, %c0_11] : memref<1x1xf32, #tpu.memory_space<vmem>>, vector<1x1xf32>
    %58 = vector.shape_cast %56 : vector<48x1xf32> to vector<1x48x1xf32>
    %cst_12 = arith.constant dense<0.000000e+00> : vector<1xf32>
    %59 = vector.multi_reduction <add>, %58, %cst_12 [1, 2] : vector<1x48x1xf32> to vector<1xf32>
    %60 = vector.shape_cast %59 : vector<1xf32> to vector<1x1x1xf32>
    %61 = vector.extract %60[0, 0, 0] : f32 from vector<1x1x1xf32>
    %62 = vector.broadcast %61 : f32 to vector<1x1xf32>
    %63 = arith.subf %57, %62 : vector<1x1xf32>
    %c0_13 = arith.constant 0 : index
    %c0_14 = arith.constant 0 : index
    %64 = vector.load %arg7[%c0_13, %c0_14] : memref<1x1xf32, #tpu.memory_space<vmem>>, vector<1x1xf32>
    tpu.vector_store %arg7[%c0_13, %c0_14], %63 {strides = array<i32>} : memref<1x1xf32, #tpu.memory_space<vmem>>, vector<1x1xf32>,
    %c0_i32_15 = arith.constant 0 : i32
    %65 = arith.cmpi eq, %arg1, %c0_i32_15 : i32
    %66 = arith.extui %65 : i1 to i32
    %c0_i32_16 = arith.constant 0 : i32
    %67 = arith.cmpi ne, %66, %c0_i32_16 : i32
    scf.if %67 {
      %c0_17 = arith.constant 0 : index
      %c0_18 = arith.constant 0 : index
      %68 = vector.load %arg7[%c0_17, %c0_18] : memref<1x1xf32, #tpu.memory_space<vmem>>, vector<1x1xf32>
      %69 = vector.shape_cast %68 : vector<1x1xf32> to vector<1x1x1xf32>
      %c0_19 = arith.constant 0 : index
      %c0_20 = arith.constant 0 : index
      %c0_21 = arith.constant 0 : index
      %70 = vector.load %arg5[%c0_19, %c0_20, %c0_21] : memref<1x1x1xf32, #tpu.memory_space<vmem>>, vector<1x1x1xf32>
      tpu.vector_store %arg5[%c0_19, %c0_20, %c0_21], %69 {strides = array<i32>} : memref<1x1x1xf32, #tpu.memory_space<vmem>>, vector<1x1x1xf32>,
    } else {
    }
    return
  }
  func.func @transform_0(%arg0: i32, %arg1: i32) -> (i32, i32) {
    %c1_i32 = arith.constant 1 : i32
    %0 = arith.muli %arg0, %c1_i32 : i32
    %1 = arith.addi %0, %arg1 : i32
    %c0_i32 = arith.constant 0 : i32
    %c0_i32_0 = arith.constant 0 : i32
    return %1, %c0_i32 : i32, i32
  }
  func.func @transform_1(%arg0: i32, %arg1: i32) -> (i32, i32) {
    %c1_i32 = arith.constant 1 : i32
    %0 = arith.muli %arg0, %c1_i32 : i32
    %1 = arith.addi %0, %arg1 : i32
    %c0_i32 = arith.constant 0 : i32
    %c0_i32_0 = arith.constant 0 : i32
    return %1, %c0_i32 : i32, i32
  }
  func.func @transform_3(%arg0: i32, %arg1: i32) -> (i32, i32, i32) {
    %c0_i32 = arith.constant 0 : i32
    %c0_i32_0 = arith.constant 0 : i32
    %c0_i32_1 = arith.constant 0 : i32
    return %arg0, %c0_i32, %c0_i32_0 : i32, i32, i32
  }
}

</mosaic_0001>

<bundles_post_ra>
// kernel: tpu_custom_call.1
= control target key start
LH: loop header
LB: loop body
LE: loop exit
PB: predicated region body
PF: predicated region fallthrough
CT: control target
= control target key end

     0   :  { %s742_s12 = smov 0   ;;  %s744_s13 = smov 0   ;;  %s880_s0 = inlined_call_operand.vmem [shape: f32[16,32], index: 0, kind: input, shape index: {}]   ;;  %s881_s1 = inlined_call_operand.vmem [shape: s32[16,6], index: 1, kind: input, shape index: {}]   ;;  %s882_s2 = inlined_call_operand.vmem [shape: f32[50,32], index: 2, kind: input, shape index: {}]   ;;  %s883_s3 = inlined_call_operand.vmem [shape: f32[2,1,1], index: 3, kind: output, shape index: {}]  }
   0x1   :  { %s746_s14 = smov 0  }
   0x2 LB: > { %s25_s15 = sadd.s32 1, %s709_s13  ;;  %p585_p0 = scmp.ge.s32.totalorder %s713_s14, 1  ;;  %s713_s14 = sphi %s746_s14, %s13_s14   ;;  %s709_s13 = sphi %s744_s13, %s887_s13   ;;  %s705_s12 = sphi %s742_s12, %s886_s12  }
   0x3   : > { %p27_p1 = scmp.ge.s32.totalorder %s25_s15, 2  ;;  %p141_p2 = scmp.lt.s32.totalorder %s713_s14, 3 }
   0x5   : > { %s889_s15 = smov (%p27_p1, %s25_s15), 0  ;;  %p142_p3 = pnand %p585_p0, %p141_p2 }
   0x6   : > { %p167_p4 = scmp.lt.s32.totalorder (!%p142_p3), %s705_s12, 1 }
   0x7   : > { %145 = sbr.rel (%p142_p3) target bundleno = 635 (0x27b), region = 28 }
   0xc   : > { %s891_s12 = smov (!%p167_p4, %s705_s12), 1 }
   0xd   : > { %s586_s16 = sshll.u32 %s891_s12, 3  ;;  %s180_s19 = scalar_lea.vmem %s883_s3, %s891_s12 }
   0xe   : > { %s770_s22 = scalar_lea.vmem %s880_s0, %s586_s16  ;;  %s176_s25 = scalar_lea.vmem %s881_s1, %s586_s16 }
   0xf   : > { %v197_v0 = vld [vmem:[%s882_s2] sm:$0xff]  ;;  %v199_v1 = vld [vmem:[%s882_s2 + $0x8] sm:$0xff]  ;;  %v201_v2 = vld [vmem:[%s882_s2 + $0x10] sm:$0xff] }
  0x10   : > { %198 = vst [vmem:[#allocation2 + $0x30] sm:$0xff] %v197_v0  ;;  %v203_v3 = vld [vmem:[%s882_s2 + $0x18] sm:$0xff]  ;;  %v205_v4 = vld [vmem:[%s882_s2 + $0x20] sm:$0xff]  ;;  %v207_v5 = vld [vmem:[%s882_s2 + $0x28] sm:$0xff] }
  0x11   : > { %200 = vst [vmem:[#allocation2] sm:$0xff] %v199_v1  ;;  %v588_v6 = vld [vmem:[%s882_s2 + $0x30] sm:$0x3] }
  0x12   : > { %202 = vst [vmem:[#allocation2 + $0x18] sm:$0xff] %v201_v2 }
  0x13   : > { %204 = vst [vmem:[#allocation2 + $0x10] sm:$0xff] %v203_v3 }
  0x14   : > { %206 = vst [vmem:[#allocation2 + $0x8] sm:$0xff] %v205_v4 }
  0x15   : > { %208 = vst [vmem:[#allocation2 + $0x20] sm:$0xff] %v207_v5 }
  0x16   : > { %220 = vst [vmem:[#allocation2 + $0x28] sm:$0x3] %v588_v6 }
  0x17   : > { %224 = vsyncadd [#allocation4], 800 }
  0x18   : > { %701 = dma.done.wait [#allocation4], 800 }
  0x19   : > { %702 = vsyncadd [#allocation4], 4294966496  ;;  %v231_v7 = vld [vmem:[%s176_s25] sm:$0xff]  ;;  %v715_v8 = vmov 3   ;;  %v716_v9 = vmov 2   ;;  %vm296_vm0 = vcmask 1041408   ;;  %v239_v21 = vlaneseq }
  0x1a   : > { %660 = vset.pattern.permute.xlu1 %v715_v8  ;;  %658 = vset.pattern.permute.xlu0 %v716_v9  ;;  %v717_v12 = vmov 0   ;;  %v235_v14 = vld [vmem:[#allocation2 + $0x10] sm:$0xff]  ;;  %v234_v15 = vld [vmem:[#allocation2 + $0x18] sm:$0xff]  ;;  %v718_v16 = vmov 1   ;;  %v719_v17 = vmov 4   ;;  %v233_v18 = vld [vmem:[#allocation2] sm:$0xff] }
  0x1b   : > { %260 = vperm.xlu1 %660, %v231_v7   ;;  %254 = vperm.xlu0 %658, %v231_v7   ;;  %v236_v13 = vld [vmem:[#allocation2 + $0x8] sm:$0xff]  ;;  %v720_v19 = vmov 5   ;;  %v232_v20 = vld [vmem:[#allocation2 + $0x30] sm:$0xff]  ;;  %v240_v22 = vand.u32 127, %v239_v21  ;;  %vm277_vm1 = vcmask 408576   ;;  %v721_v24 = vmov 0.0  }
  0x1c   : > { %v237_v11 = vld [vmem:[#allocation2 + $0x20] sm:$0xff]  ;;  %662 = vset.pattern.permute.xlu2 %v717_v12  ;;  %vm341_vm8 = vcmask 261120   ;;  %vm476_vm11 = vcmask 7168  }
  0x1d   : > { %v238_v10 = vld [vmem:[#allocation2 + $0x28] sm:$0x3]  ;;  %242 = vperm.xlu2 %662, %v231_v7   ;;  %v230_v36 = vld [vmem:[%s770_s22] sm:$0xff] }
  0x1e   : > { %595 = vmatpush.msk.msra.mxu0 %vm296_vm0, %v238_v10  ;;  %605 = vmatpush.msk.msra.mxu2 %vm296_vm0, %v238_v10 }
  0x1f   : > { %604 = vmatpush.msk.msra.mxu1 %vm296_vm0, %v238_v10  ;;  %606 = vmatpush.msk.msra.mxu3 %vm296_vm0, %v238_v10  ;;  %vm228_vm0 = vcmask 0  }
  0x20   : > { %310 = vmatpush.msra.mxu0 %v237_v11  ;;  %608 = vmatpush.msra.mxu2 %v237_v11  ;;  %229 = vst.msk [vmem:[#allocation3] sm:$0x1] %vm228_vm0, %v721_v24 }
  0x21   : > { %607 = vmatpush.msra.mxu1 %v237_v11  ;;  %609 = vmatpush.msra.mxu3 %v237_v11 }
  0x22   : > { %311 = vmatpush.msra.mxu0 %v236_v13  ;;  %611 = vmatpush.msra.mxu2 %v236_v13 }
  0x23   : > { %610 = vmatpush.msra.mxu1 %v236_v13  ;;  %661 = vset.pattern.permute.xlu1 %v718_v16 }
  0x24   : > { %312 = vmatpush.msra.mxu0 %v235_v14  ;;  %659 = vset.pattern.permute.xlu0 %v719_v17 }
  0x25   : > { %248 = vperm.xlu1 %661, %v231_v7   ;;  %266 = vperm.xlu0 %659, %v231_v7  }
  0x26   : > { %663 = vset.pattern.permute.xlu2 %v720_v19  ;;  %313 = vmatpush.msra.mxu0 %v234_v15 }
  0x27   : > { %272 = vperm.xlu2 %663, %v231_v7   ;;  %614 = vmatpush.msra.mxu2 %v235_v14 }
  0x28   : > { %314 = vmatpush.msra.mxu0 %v233_v18  ;;  %612 = vmatpush.msra.mxu3 %v236_v13 }
  0x29   : > { %617 = vmatpush.msra.mxu2 %v234_v15  ;;  %613 = vmatpush.msra.mxu1 %v235_v14 }
  0x2a   : > { %615 = vmatpush.msra.mxu3 %v235_v14  ;;  %315 = vmatpush.msra.mxu0 %v232_v20 }
  0x2b   : > { %620 = vmatpush.msra.mxu2 %v233_v18  ;;  %616 = vmatpush.msra.mxu1 %v234_v15 }
  0x2c   : > { %618 = vmatpush.msra.mxu3 %v234_v15 }
  0x2d   : > { %619 = vmatpush.msra.mxu1 %v233_v18  ;;  %664 = vset.pattern.permute.xlu0 %v720_v19 }
  0x2e   : > { %621 = vmatpush.msra.mxu3 %v233_v18  ;;  %623 = vmatpush.msra.mxu2 %v232_v20 }
  0x2f   : > { %622 = vmatpush.msra.mxu1 %v232_v20 }
  0x30   : > { %624 = vmatpush.msra.mxu3 %v232_v20 }
  0x77   : > { %v243_v23 = vpop.permute.xlu2 %242 }
  0x78   : > { %vm244_vm2 = vcmp.eq.s32.totalorder %v240_v22, %v243_v23 }
  0x79   : > { %v589_v25 = vsel %vm244_vm2, 1.0, %v721_v24 }
  0x7a   : > { %596 = vmatmul.msk.f32.vlgmr.msra.gmra.mxu0 %vm277_vm1, %v589_v25 }
  0x81   : > { %v273_v34 = vpop.permute.xlu2 %272 }
  0x82   : > { %vm274_vm7 = vcmp.eq.s32.totalorder %v240_v22, %v273_v34 }
  0x83   : > { %v594_v35 = vsel %vm274_vm7, 1.0, %v721_v24 }
  0x8d   : > { %v255_v26 = vpop.permute.xlu0 %254  ;;  %v261_v27 = vpop.permute.xlu1 %260 }
  0x8e   : > { %vm256_vm3 = vcmp.eq.s32.totalorder %v240_v22, %v255_v26  ;;  %vm262_vm4 = vcmp.eq.s32.totalorder %v240_v22, %v261_v27 }
  0x8f   : > { %v591_v28 = vsel %vm256_vm3, 1.0, %v721_v24  ;;  %v592_v31 = vsel %vm262_vm4, 1.0, %v721_v24 }
  0x90   : > { %598 = vmatmul.msk.f32.vlgmr.msra.gmra.mxu2 %vm277_vm1, %v591_v28 }
  0x97   : > { %v249_v29 = vpop.permute.xlu1 %248  ;;  %v267_v30 = vpop.permute.xlu0 %266 }
  0x98   : > { %vm250_vm5 = vcmp.eq.s32.totalorder %v240_v22, %v249_v29  ;;  %vm268_vm6 = vcmp.eq.s32.totalorder %v240_v22, %v267_v30  ;;  %599 = vmatmul.msk.f32.gmra.mxu2 %vm277_vm1, %v592_v31 }
  0x99   : > { %v590_v32 = vsel %vm250_vm5, 1.0, %v721_v24  ;;  %v593_v33 = vsel %vm268_vm6, 1.0, %v721_v24 }
  0x9a   : > { %597 = vmatmul.msk.f32.vlgmr.msra.gmra.mxu1 %vm277_vm1, %v590_v32  ;;  %600 = vmatmul.msk.f32.vlgmr.msra.gmra.mxu3 %vm277_vm1, %v593_v33 }
  0xa2   : > { %601 = vmatmul.msk.f32.gmra.mxu3 %vm277_vm1, %v594_v35 }
  0xf7   : > { %v317_v37 = vpop.f32.mrf.mxu0 }
  0xf8   : > { %v335_v38 = vmul.f32 %v317_v37, %v230_v36 }
  0xfa   : > { %v342_v39 = vsel %vm341_vm8, %v335_v38, 0.0 }
  0xfb   : > { %343 = vadd.xlane.f32.xlu2 %v342_v39 }
 0x113   : > { %v323_v40 = vpop.f32.mrf.mxu2 }
 0x114   : > { %v337_v41 = vmul.f32 %v323_v40, %v230_v36 }
 0x116   : > { %v348_v43 = vsel %vm341_vm8, %v337_v41, 0.0 }
 0x117   : > { %v320_v42 = vpop.f32.mrf.mxu1  ;;  %349 = vadd.xlane.f32.xlu0 %v348_v43 }
 0x118   : > { %v336_v44 = vmul.f32 %v320_v42, %v230_v36 }
 0x11a   : > { %v345_v45 = vsel %vm341_vm8, %v336_v44, 0.0 }
 0x11b   : > { %346 = vadd.xlane.f32.xlu1 %v345_v45  ;;  %v326_v46 = vpop.f32.mrf.mxu2 }
 0x11c   : > { %v338_v47 = vmul.f32 %v326_v46, %v230_v36 }
 0x11d   : > { %v329_v48 = vpop.f32.mrf.mxu3 }
 0x11e   : > { %v339_v49 = vmul.f32 %v329_v48, %v230_v36  ;;  %v351_v50 = vsel %vm341_vm8, %v338_v47, 0.0 }
 0x11f   : > { %352 = vadd.xlane.f32.xlu2 %v351_v50 }
 0x120   : > { %v354_v51 = vsel %vm341_vm8, %v339_v49, 0.0 }
 0x123   : > { %355 = vadd.xlane.f32.xlu1 %v354_v51 }
 0x125   : > { %v332_v52 = vpop.f32.mrf.mxu3 }
 0x126   : > { %v340_v53 = vmul.f32 %v332_v52, %v230_v36 }
 0x128   : > { %v357_v54 = vsel %vm341_vm8, %v340_v53, 0.0 }
 0x129   : > { %358 = vadd.xlane.f32.xlu2 %v357_v54 }
 0x16e   : > { %v815_v55 = vpop.xlane.xlu2 %343 }
 0x16f   : > { %v391_v56 = vand.u32 2147483647, %v815_v55  ;;  %v385_v42 = vmin.f32 %v815_v55, 0.0 }
 0x171   : > { %v397_v57 = vsub.f32 0.0, %v391_v56 }
 0x173   : > { %v403_v58 = vmul.f32 1.442695, %v397_v57 }
 0x175   : > { %665 = vpow2.f32 %v403_v58 }
 0x17b   : > { %v666_v2 = vpop.eup %665 }
 0x17c   : > { %v415_v7 = vadd.f32 1.0, %v666_v2  ;;  %v418_v13 = vmul.f32 -0.5, %v666_v2  ;;  %v421_v28 = vand.u32 2147483647, %v666_v2 }
 0x17e   : > { %v419_v21 = vadd.f32 1.0, %v418_v13  ;;  %vm841_vm9 = vcmp.lt.f32.partialorder %v421_v28, 0.0004427343 }
 0x180   : > { %v420_v33 = vmul.f32 %v666_v2, %v419_v21 }
 0x18a   : > { %v818_v59 = vpop.xlane.xlu0 %349 }
 0x18b   : > { %v375_v60 = vsub.f32 0.0, %v818_v59 }
 0x18d   : > { %v393_v61 = vand.u32 2147483647, %v375_v60 }
 0x18e   : > { %v823_v62 = vpop.xlane.xlu1 %346 }
 0x18f   : > { %v374_v63 = vsub.f32 0.0, %v823_v62  ;;  %v399_v0 = vsub.f32 0.0, %v393_v61 }
 0x191   : > { %v392_v1 = vand.u32 2147483647, %v374_v63  ;;  %v407_v3 = vmul.f32 1.442695, %v399_v0  ;;  %v386_v53 = vmin.f32 %v374_v63, 0.0  ;;  %v387_v0 = vmin.f32 %v375_v60, 0.0 }
 0x192   : > { %v826_v5 = vpop.xlane.xlu2 %352 }
 0x193   : > { %v398_v4 = vsub.f32 0.0, %v392_v1  ;;  %667 = vpow2.f32 %v407_v3  ;;  %v376_v6 = vsub.f32 0.0, %v826_v5 }
 0x195   : > { %v405_v8 = vmul.f32 1.442695, %v398_v4  ;;  %v394_v9 = vand.u32 2147483647, %v376_v6 }
 0x196   : > { %v831_v10 = vpop.xlane.xlu1 %355 }
 0x197   : > { %669 = vpow2.f32 %v405_v8  ;;  %v377_v11 = vsub.f32 0.0, %v831_v10  ;;  %v400_v12 = vsub.f32 0.0, %v394_v9 }
 0x198   : > { %671 = vlog2.f32 %v415_v7 }
 0x199   : > { %v395_v14 = vand.u32 2147483647, %v377_v11  ;;  %v668_v15 = vpop.eup %667  ;;  %v409_v16 = vmul.f32 1.442695, %v400_v12 }
 0x19a   : > { %v433_v17 = vadd.f32 1.0, %v668_v15  ;;  %v436_v29 = vmul.f32 -0.5, %v668_v15  ;;  %v439_v47 = vand.u32 2147483647, %v668_v15 }
 0x19b   : > { %v401_v18 = vsub.f32 0.0, %v395_v14  ;;  %673 = vpow2.f32 %v409_v16  ;;  %v388_v14 = vmin.f32 %v376_v6, 0.0 }
 0x19c   : > { %v836_v19 = vpop.xlane.xlu2 %358  ;;  %675 = vlog2.f32 %v433_v17  ;;  %v437_v43 = vadd.f32 1.0, %v436_v29  ;;  %vm440_vm12 = vcmp.lt.f32.partialorder %v439_v47, 0.0004427343 }
 0x19d   : > { %v670_v20 = vpop.eup %669  ;;  %v411_v22 = vmul.f32 1.442695, %v401_v18  ;;  %v378_v26 = vsub.f32 0.0, %v836_v19 }
 0x19e   : > { %v424_v23 = vadd.f32 1.0, %v670_v20  ;;  %v427_v25 = vmul.f32 -0.5, %v670_v20  ;;  %v672_v27 = vpop.eup %671  ;;  %v430_v39 = vand.u32 2147483647, %v670_v20  ;;  %v438_v55 = vmul.f32 %v668_v15, %v437_v43  ;;  %v475_v43 = vld [vmem:[#allocation3] sm:$0x1] }
 0x19f   : > { %677 = vpow2.f32 %v411_v22  ;;  %v396_v30 = vand.u32 2147483647, %v378_v26  ;;  %v417_v32 = vmul.f32 0.6931472, %v672_v27 }
 0x1a0   : > { %679 = vlog2.f32 %v424_v23  ;;  %v428_v34 = vadd.f32 1.0, %v427_v25  ;;  %vm431_vm10 = vcmp.lt.f32.partialorder %v430_v39, 0.0004427343  ;;  %v389_v23 = vmin.f32 %v377_v11, 0.0 }
 0x1a1   : > { %v674_v31 = vpop.eup %673  ;;  %v402_v37 = vsub.f32 0.0, %v396_v30  ;;  %v423_v46 = vsel %vm841_vm9, %v420_v33, %v417_v32  ;;  %v390_v33 = vmin.f32 %v378_v26, 0.0 }
 0x1a2   : > { %v442_v36 = vadd.f32 1.0, %v674_v31  ;;  %v676_v38 = vpop.eup %675  ;;  %v445_v40 = vmul.f32 -0.5, %v674_v31  ;;  %v429_v48 = vmul.f32 %v670_v20, %v428_v34  ;;  %v469_v56 = vsub.f32 %v385_v42, %v423_v46 }
 0x1a3   : > { %v413_v44 = vmul.f32 1.442695, %v402_v37  ;;  %v435_v50 = vmul.f32 0.6931472, %v676_v38  ;;  %v448_v58 = vand.u32 2147483647, %v674_v31 }
 0x1a4   : > { %681 = vlog2.f32 %v442_v36  ;;  %v446_v54 = vadd.f32 1.0, %v445_v40  ;;  %v477_v9 = vsel %vm476_vm11, %v469_v56, 0.0 }
 0x1a5   : > { %v678_v41 = vpop.eup %677  ;;  %683 = vpow2.f32 %v413_v44  ;;  %v441_v1 = vsel %vm440_vm12, %v438_v55, %v435_v50  ;;  %vm449_vm13 = vcmp.lt.f32.partialorder %v448_v58, 0.0004427343 }
 0x1a6   : > { %v680_v45 = vpop.eup %679  ;;  %v451_v49 = vadd.f32 1.0, %v678_v41  ;;  %v454_v52 = vmul.f32 -0.5, %v678_v41  ;;  %v447_v63 = vmul.f32 %v674_v31, %v446_v54  ;;  %v457_v7 = vand.u32 2147483647, %v678_v41 }
 0x1a7   : > { %v426_v51 = vmul.f32 0.6931472, %v680_v45  ;;  %v471_v13 = vsub.f32 %v387_v0, %v441_v1 }
 0x1a8   : > { %685 = vlog2.f32 %v451_v49  ;;  %v455_v2 = vadd.f32 1.0, %v454_v52  ;;  %vm458_vm14 = vcmp.lt.f32.partialorder %v457_v7, 0.0004427343 }
 0x1a9   : > { %v432_v57 = vsel %vm431_vm10, %v429_v48, %v426_v51  ;;  %v480_v22 = vsel %vm476_vm11, %v471_v13, 0.0 }
 0x1aa   : > { %v470_v61 = vsub.f32 %v386_v53, %v432_v57  ;;  %v682_v62 = vpop.eup %681  ;;  %v456_v17 = vmul.f32 %v678_v41, %v455_v2 }
 0x1ab   : > { %v444_v4 = vmul.f32 0.6931472, %v682_v62  ;;  %v684_v8 = vpop.eup %683 }
 0x1ac   : > { %v478_v3 = vsel %vm476_vm11, %v470_v61, 0.0  ;;  %v460_v16 = vadd.f32 1.0, %v684_v8  ;;  %v463_v18 = vmul.f32 -0.5, %v684_v8  ;;  %v466_v5 = vand.u32 2147483647, %v684_v8 }
 0x1ad   : > { %v450_v15 = vsel %vm449_vm13, %v447_v63, %v444_v4  ;;  %v479_v59 = vadd.f32 %v478_v3, %v477_v9 }
 0x1ae   : > { %v686_v12 = vpop.eup %685  ;;  %v472_v20 = vsub.f32 %v388_v14, %v450_v15  ;;  %687 = vlog2.f32 %v460_v16  ;;  %v464_v25 = vadd.f32 1.0, %v463_v18  ;;  %vm467_vm15 = vcmp.lt.f32.partialorder %v466_v5, 0.0004427343 }
 0x1af   : > { %v453_v60 = vmul.f32 0.6931472, %v686_v12  ;;  %v481_v27 = vadd.f32 %v480_v22, %v479_v59 }
 0x1b0   : > { %v482_v6 = vsel %vm476_vm11, %v472_v20, 0.0  ;;  %v465_v31 = vmul.f32 %v684_v8, %v464_v25 }
 0x1b1   : > { %v459_v21 = vsel %vm458_vm14, %v456_v17, %v453_v60  ;;  %v483_v32 = vadd.f32 %v482_v6, %v481_v27 }
 0x1b2   : > { %v473_v28 = vsub.f32 %v389_v23, %v459_v21 }
 0x1b4   : > { %v688_v29 = vpop.eup %687  ;;  %v484_v34 = vsel %vm476_vm11, %v473_v28, 0.0 }
 0x1b5   : > { %v462_v30 = vmul.f32 0.6931472, %v688_v29  ;;  %v485_v10 = vadd.f32 %v484_v34, %v483_v32 }
 0x1b7   : > { %v468_v35 = vsel %vm467_vm15, %v465_v31, %v462_v30 }
 0x1b8   : > { %v474_v36 = vsub.f32 %v390_v33, %v468_v35 }
 0x1ba   : > { %v486_v11 = vsel %vm476_vm11, %v474_v36, 0.0 }
 0x1bb   : > { %v487_v37 = vadd.f32 %v486_v11, %v485_v10 }
 0x1bd   : > { %488 = vadd.xlane.f32.xlu0 %v487_v37 }
 0x230   : > { %v489_v38 = vpop.xlane.xlu0 %488 }
 0x231   : > { %v490_v39 = vrot.slane %v489_v38, 4 }
 0x233   : > { %v491_v40 = vadd.f32 %v490_v39, %v489_v38 }
 0x235   : > { %v492_v19 = vrot.slane %v491_v40, 2 }
 0x237   : > { %v493_v26 = vadd.f32 %v492_v19, %v491_v40 }
 0x239   : > { %v494_v41 = vrot.slane %v493_v26, 1 }
 0x23b   : > { %v495_v42 = vadd.f32 %v494_v41, %v493_v26 }
 0x23d   : > { %625 = vpush %v495_v42 }
 0x26e   : > { %s626_s17 = spop %625 }
 0x26f   : > { %v497_v44 = vstv %s626_s17 }
 0x270   : > { %v498_v45 = vsub.f32 %v475_v43, %v497_v44 }
 0x272   : > { %500 = vst.msk [vmem:[#allocation3] sm:$0x1] %vm228_vm0, %v498_v45 }
 0x279   : > { %v504_v46 = vld [vmem:[#allocation3] sm:$0x1] }
 0x27a   : > { %505 = vst.msk [vmem:[%s180_s19] sm:$0x1] %vm228_vm0, %v504_v46 }
 0x27b PF: > { %s13_s14 = sadd.s32 1, %s713_s14   ;;  %s886_s12 = smov %s709_s13 }
 0x27c   : > { %p10_p5 = scmp.ge.s32.totalorder %s13_s14, 4   ;;  %s887_s13 = smov %s889_s15 }
 0x27e   :  { %12 = sbr.rel (!%p10_p5) target bundleno = 2 (0x2), region = 102 }

</bundles_post_ra>
